<compile_context>
chip_gen: v6e
topology: v6e:2x2x1
jax: 0.10.0
libtpu: 0.0.40
codegen_flags: <defaults>
</compile_context>

<pallas_src>
import functools

import jax
import jax.numpy as jnp
from jax.experimental import pallas as pl
from jax.experimental.pallas import tpu as pltpu

BN_EPS = 1e-5


def _gated_fusion_kernel(face_ref, voice_ref, w1_ref, w2_ref, p_ref,
                         out_ref, face_t_ref, voice_t_ref, *, B, E, M, O):
    face = face_ref[...]                               # [B, E], lane-0 aligned
    voice = voice_ref[...]                             # [B, E], lane-0 aligned

    # ---- attention branch -------------------------------------------------
    # Linear(2E -> M) as two small MXU matmuls over static row-slices of w1
    # (free Ref views; E is a multiple of 8 so the slice is sublane-aligned).
    # Bias b1 omitted (cancelled by training-mode BN, see header).
    h = (jnp.dot(face, w1_ref[:E, :], preferred_element_type=jnp.float32)
         + jnp.dot(voice, w1_ref[E:, :], preferred_element_type=jnp.float32))  # [B, M]

    # BatchNorm1d training-mode batch stats as independent reductions.
    inv_b = 1.0 / B
    s1 = jnp.sum(h, axis=0, keepdims=True)
    s2 = jnp.sum(h * h, axis=0, keepdims=True)
    mu = s1 * inv_b
    var = jnp.maximum(s2 * inv_b - mu * mu, 0.0)       # biased batch variance

    p = p_ref[...]                                     # [3, P] packed params
    gamma = p[0:1, :M]
    beta = p[1:2, :M]
    b2 = p[2:3, :O]

    # Fold BN into a single scale/shift (1 mul + 1 add per element).
    scale = gamma * jax.lax.rsqrt(var + BN_EPS)
    shift = beta - mu * scale
    h_relu = jnp.maximum(h * scale + shift, 0.0)       # ReLU; Dropout(p=0) = id

    # Linear(M -> O) + sigmoid.
    att = jax.nn.sigmoid(
        jnp.dot(h_relu, w2_ref[...], preferred_element_type=jnp.float32) + b2)  # [B, O]

    # ---- identity branches + gate (all lane-0-aligned, no XLU work) --------
    face_t = jnp.tanh(face)                            # [B, E]
    voice_t = jnp.tanh(voice)                          # [B, E]
    out = voice_t + att * (face_t - voice_t)           # == f*a + (1-a)*v

    out_ref[...] = out
    face_t_ref[...] = face_t
    voice_t_ref[...] = voice_t


def pack_params(params):
    """One-time (init-time) packing of the small per-column parameters.

    Returns (w1, w2, pvec) where pvec = [gamma; beta; b2] padded to a common
    lane width.  Pure layout plumbing, done once -- NOT per forward call.
    """
    M = params["w1"].shape[1]
    O = params["w2"].shape[1]
    P = max(M, O)

    def pad_row(v):
        v = v.reshape(1, -1).astype(jnp.float32)
        return jnp.pad(v, ((0, 0), (0, P - v.shape[1])))

    pvec = jnp.concatenate(
        [pad_row(params["gamma"]), pad_row(params["beta"]), pad_row(params["b2"])],
        axis=0)                                        # [3, P]
    return params["w1"].astype(jnp.float32), params["w2"].astype(jnp.float32), pvec


def gated_fusion(face, voice, w1, w2, pvec):
    """Forward pass. `w1, w2, pvec` come from pack_params (called once)."""
    B, E = face.shape
    M = w1.shape[1]
    O = w2.shape[1]
    P = pvec.shape[1]
    assert w1.shape[0] == 2 * E
    assert O == E, "elementwise gate requires emb_dim_out == embed_dim_in"

    vmem = pl.BlockSpec(memory_space=pltpu.MemorySpace.VMEM)
    kernel = functools.partial(_gated_fusion_kernel, B=B, E=E, M=M, O=O)

    flops = 2 * B * (2 * E) * M + 2 * B * M * O
    transcendentals = B * (2 * E) + B * O + M          # tanh + sigmoid + rsqrt
    bytes_accessed = 4 * (2 * B * E + 2 * E * M + M * O + 3 * P   # inputs
                          + B * O + 2 * B * E)                    # outputs

    # Everything fits trivially in VMEM at these sizes -> single program, no grid.
    out, face_t, voice_t = pl.pallas_call(
        kernel,
        out_shape=(
            jax.ShapeDtypeStruct((B, O), jnp.float32),
            jax.ShapeDtypeStruct((B, E), jnp.float32),
            jax.ShapeDtypeStruct((B, E), jnp.float32),
        ),
        in_specs=[vmem, vmem, vmem, vmem, vmem],
        out_specs=(vmem, vmem, vmem),
        cost_estimate=pl.CostEstimate(
            flops=flops,
            transcendentals=transcendentals,
            bytes_accessed=bytes_accessed),
    )(face, voice, w1, w2, pvec)
    return out, face_t, voice_t


def reference_jax(face, voice, params):
    """Pure-JAX reference of the PyTorch forward (training-mode BN, keeps b1)."""
    concat = jnp.concatenate([face, voice], axis=1)
    h = concat @ params["w1"] + params["b1"]
    mu = jnp.mean(h, axis=0, keepdims=True)
    var = jnp.mean((h - mu) ** 2, axis=0, keepdims=True)
    h = params["gamma"] * (h - mu) / jnp.sqrt(var + BN_EPS) + params["beta"]
    h = jnp.maximum(h, 0.0)
    att = jax.nn.sigmoid(h @ params["w2"] + params["b2"])
    face_t = jnp.tanh(face)
    voice_t = jnp.tanh(voice)
    out = face_t * att + (1.0 - att) * voice_t
    return out, face_t, voice_t


if __name__ == "__main__":
    # Small shapes: embed_dim_in == emb_dim_out (required for the elementwise
    # gating to broadcast, as in the PyTorch module), mid_att_dim = 64.
    B = 8
    EMBED_DIM_IN = 32
    MID_ATT_DIM = 64
    EMB_DIM_OUT = 32

    key = jax.random.PRNGKey(0)
    kf, kv, kw1, kb1, kg, kbt, kw2, kb2 = jax.random.split(key, 8)

    face = jax.random.normal(kf, (B, EMBED_DIM_IN), dtype=jnp.float32)
    voice = jax.random.normal(kv, (B, EMBED_DIM_IN), dtype=jnp.float32)

    # Deterministic synthetic parameters (PyTorch-like small init).
    # Weights are stored as [in, out] so x @ W + b == PyTorch x @ W.T + b.
    params = {
        "w1": 0.1 * jax.random.normal(kw1, (2 * EMBED_DIM_IN, MID_ATT_DIM), dtype=jnp.float32),
        "b1": 0.1 * jax.random.normal(kb1, (1, MID_ATT_DIM), dtype=jnp.float32),
        "gamma": 1.0 + 0.05 * jax.random.normal(kg, (1, MID_ATT_DIM), dtype=jnp.float32),
        "beta": 0.05 * jax.random.normal(kbt, (1, MID_ATT_DIM), dtype=jnp.float32),
        "w2": 0.1 * jax.random.normal(kw2, (MID_ATT_DIM, EMB_DIM_OUT), dtype=jnp.float32),
        "b2": 0.1 * jax.random.normal(kb2, (1, EMB_DIM_OUT), dtype=jnp.float32),
    }

    # One-time parameter packing (init-time layout work, not per-call).
    w1, w2, pvec = pack_params(params)
    w1, w2, pvec = jax.block_until_ready((w1, w2, pvec))

    out, face_t, voice_t = jax.block_until_ready(gated_fusion(face, voice, w1, w2, pvec))

    # Correctness check vs pure-JAX reference (which keeps b1 — it cancels under
    # training-mode BN, so any difference is pure fp rounding).
    out_r, face_t_r, voice_t_r = reference_jax(face, voice, params)
    assert jnp.allclose(out, out_r, atol=1e-5, rtol=1e-5)
    assert jnp.allclose(face_t, face_t_r, atol=1e-5, rtol=1e-5)
    assert jnp.allclose(voice_t, voice_t_r, atol=1e-5, rtol=1e-5)

    print("KERNEL_OK")
</pallas_src>

<mosaic_0001>
module attributes {stable_mosaic.version = 11 : i64} {
  func.func @_gated_fusion_kernel(%arg0: memref<8x32xf32, #tpu.memory_space<vmem>>, %arg1: memref<8x32xf32, #tpu.memory_space<vmem>>, %arg2: memref<64x64xf32, #tpu.memory_space<vmem>>, %arg3: memref<64x32xf32, #tpu.memory_space<vmem>>, %arg4: memref<3x64xf32, #tpu.memory_space<vmem>>, %arg5: memref<8x32xf32, #tpu.memory_space<vmem>>, %arg6: memref<8x32xf32, #tpu.memory_space<vmem>>, %arg7: memref<8x32xf32, #tpu.memory_space<vmem>>) attributes {dimension_semantics = [], scalar_prefetch = 0 : i64, scratch_operands = 0 : i64, tpu.core_type = #tpu.core_type<tc>} {
    %c0 = arith.constant 0 : index
    %c0_0 = arith.constant 0 : index
    %0 = vector.load %arg0[%c0, %c0_0] : memref<8x32xf32, #tpu.memory_space<vmem>>, vector<8x32xf32>
    %c0_1 = arith.constant 0 : index
    %c0_2 = arith.constant 0 : index
    %1 = vector.load %arg1[%c0_1, %c0_2] : memref<8x32xf32, #tpu.memory_space<vmem>>, vector<8x32xf32>
    %c0_3 = arith.constant 0 : index
    %c0_4 = arith.constant 0 : index
    %2 = vector.load %arg2[%c0_3, %c0_4] : memref<64x64xf32, #tpu.memory_space<vmem>>, vector<32x64xf32>
    %cst = arith.constant dense<0.000000e+00> : vector<8x64xf32>
    %3 = tpu.matmul %0, %2, %cst {dimension_numbers = #tpu.dot_dimension_numbers<[1], [0], [0], [1], [0, 0, 1, 1], [], []>} : vector<8x32xf32>, vector<32x64xf32>, vector<8x64xf32> -> vector<8x64xf32>
    %c32 = arith.constant 32 : index
    %c0_5 = arith.constant 0 : index
    %4 = vector.load %arg2[%c32, %c0_5] : memref<64x64xf32, #tpu.memory_space<vmem>>, vector<32x64xf32>
    %cst_6 = arith.constant dense<0.000000e+00> : vector<8x64xf32>
    %5 = tpu.matmul %1, %4, %cst_6 {dimension_numbers = #tpu.dot_dimension_numbers<[1], [0], [0], [1], [0, 0, 1, 1], [], []>} : vector<8x32xf32>, vector<32x64xf32>, vector<8x64xf32> -> vector<8x64xf32>
    %6 = arith.addf %3, %5 : vector<8x64xf32>
    %cst_7 = arith.constant dense<0.000000e+00> : vector<64xf32>
    %7 = vector.multi_reduction <add>, %6, %cst_7 [0] : vector<8x64xf32> to vector<64xf32>
    %8 = vector.shape_cast %7 : vector<64xf32> to vector<1x64xf32>
    %9 = arith.mulf %6, %6 : vector<8x64xf32>
    %cst_8 = arith.constant dense<0.000000e+00> : vector<64xf32>
    %10 = vector.multi_reduction <add>, %9, %cst_8 [0] : vector<8x64xf32> to vector<64xf32>
    %11 = vector.shape_cast %10 : vector<64xf32> to vector<1x64xf32>
    %cst_9 = arith.constant 1.250000e-01 : f32
    %12 = vector.broadcast %cst_9 : f32 to vector<1x64xf32>
    %13 = arith.mulf %8, %12 : vector<1x64xf32>
    %cst_10 = arith.constant 1.250000e-01 : f32
    %14 = vector.broadcast %cst_10 : f32 to vector<1x64xf32>
    %15 = arith.mulf %11, %14 : vector<1x64xf32>
    %16 = arith.mulf %13, %13 : vector<1x64xf32>
    %17 = arith.subf %15, %16 : vector<1x64xf32>
    %cst_11 = arith.constant 0.000000e+00 : f32
    %18 = vector.broadcast %cst_11 : f32 to vector<1x64xf32>
    %19 = arith.maximumf %17, %18 : vector<1x64xf32>
    %c0_12 = arith.constant 0 : index
    %c0_13 = arith.constant 0 : index
    %20 = vector.load %arg4[%c0_12, %c0_13] : memref<3x64xf32, #tpu.memory_space<vmem>>, vector<3x64xf32>
    %21 = vector.extract_strided_slice %20 {offsets = [0, 0], sizes = [1, 64], strides = [1, 1]} : vector<3x64xf32> to vector<1x64xf32>
    %22 = vector.extract_strided_slice %20 {offsets = [1, 0], sizes = [1, 64], strides = [1, 1]} : vector<3x64xf32> to vector<1x64xf32>
    %23 = vector.extract_strided_slice %20 {offsets = [2, 0], sizes = [1, 32], strides = [1, 1]} : vector<3x64xf32> to vector<1x32xf32>
    %cst_14 = arith.constant 9.99999974E-6 : f32
    %24 = vector.broadcast %cst_14 : f32 to vector<1x64xf32>
    %25 = arith.addf %19, %24 : vector<1x64xf32>
    %26 = math.rsqrt %25 : vector<1x64xf32>
    %27 = arith.mulf %21, %26 : vector<1x64xf32>
    %28 = arith.mulf %13, %27 : vector<1x64xf32>
    %29 = arith.subf %22, %28 : vector<1x64xf32>
    %30 = vector.broadcast %27 : vector<1x64xf32> to vector<8x64xf32>
    %31 = arith.mulf %6, %30 : vector<8x64xf32>
    %32 = vector.broadcast %29 : vector<1x64xf32> to vector<8x64xf32>
    %33 = arith.addf %31, %32 : vector<8x64xf32>
    %cst_15 = arith.constant 0.000000e+00 : f32
    %34 = vector.broadcast %cst_15 : f32 to vector<8x64xf32>
    %35 = arith.maximumf %33, %34 : vector<8x64xf32>
    %c0_16 = arith.constant 0 : index
    %c0_17 = arith.constant 0 : index
    %36 = vector.load %arg3[%c0_16, %c0_17] : memref<64x32xf32, #tpu.memory_space<vmem>>, vector<64x32xf32>
    %cst_18 = arith.constant dense<0.000000e+00> : vector<8x32xf32>
    %37 = tpu.matmul %35, %36, %cst_18 {dimension_numbers = #tpu.dot_dimension_numbers<[1], [0], [0], [1], [0, 0, 1, 1], [], []>} : vector<8x64xf32>, vector<64x32xf32>, vector<8x32xf32> -> vector<8x32xf32>
    %38 = vector.broadcast %23 : vector<1x32xf32> to vector<8x32xf32>
    %39 = arith.addf %37, %38 : vector<8x32xf32>
    %40 = arith.negf %39 : vector<8x32xf32>
    %41 = math.exp %40 : vector<8x32xf32>
    %cst_19 = arith.constant 1.000000e+00 : f32
    %42 = vector.broadcast %cst_19 : f32 to vector<8x32xf32>
    %43 = arith.addf %42, %41 : vector<8x32xf32>
    %44 = arith.divf %42, %43 : vector<8x32xf32>
    %45 = math.tanh %0 : vector<8x32xf32>
    %46 = math.tanh %1 : vector<8x32xf32>
    %47 = arith.subf %45, %46 : vector<8x32xf32>
    %48 = arith.mulf %44, %47 : vector<8x32xf32>
    %49 = arith.addf %46, %48 : vector<8x32xf32>
    %c0_20 = arith.constant 0 : index
    %c0_21 = arith.constant 0 : index
    %50 = vector.load %arg5[%c0_20, %c0_21] : memref<8x32xf32, #tpu.memory_space<vmem>>, vector<8x32xf32>
    tpu.vector_store %arg5[%c0_20, %c0_21], %49 {strides = array<i32>} : memref<8x32xf32, #tpu.memory_space<vmem>>, vector<8x32xf32>,
    %c0_22 = arith.constant 0 : index
    %c0_23 = arith.constant 0 : index
    %51 = vector.load %arg6[%c0_22, %c0_23] : memref<8x32xf32, #tpu.memory_space<vmem>>, vector<8x32xf32>
    tpu.vector_store %arg6[%c0_22, %c0_23], %45 {strides = array<i32>} : memref<8x32xf32, #tpu.memory_space<vmem>>, vector<8x32xf32>,
    %c0_24 = arith.constant 0 : index
    %c0_25 = arith.constant 0 : index
    %52 = vector.load %arg7[%c0_24, %c0_25] : memref<8x32xf32, #tpu.memory_space<vmem>>, vector<8x32xf32>
    tpu.vector_store %arg7[%c0_24, %c0_25], %46 {strides = array<i32>} : memref<8x32xf32, #tpu.memory_space<vmem>>, vector<8x32xf32>,
    return
  }
}

</mosaic_0001>

<bundles_post_ra>
// kernel: tpu_custom_call.1
= control target key start
LH: loop header
LB: loop body
LE: loop exit
PB: predicated region body
PF: predicated region fallthrough
CT: control target
= control target key end

     0   :  { %13 = vsyncpa [#allocation3], 0  ;;  %v506_v1 = vmov 0.0   ;;  %vm507_vm0 = vmmov 0   ;;  %s637_s0 = inlined_call_operand.vmem [shape: f32[8,32], index: 0, kind: input, shape index: {}]   ;;  %s638_s1 = inlined_call_operand.vmem [shape: f32[8,32], index: 1, kind: input, shape index: {}]   ;;  %s639_s2 = inlined_call_operand.vmem [shape: f32[64,64], index: 2, kind: input, shape index: {}]   ;;  %s640_s3 = inlined_call_operand.vmem [shape: f32[64,32], index: 3, kind: input, shape index: {}]   ;;  %s641_s4 = inlined_call_operand.vmem [shape: f32[3,64], index: 4, kind: input, shape index: {}]   ;;  %s642_s5 = inlined_call_operand.hbm [shape: f32[8,32], index: 5, kind: output, shape index: {0}]   ;;  %s643_s6 = inlined_call_operand.hbm [shape: f32[8,32], index: 6, kind: output, shape index: {1}]   ;;  %s644_s7 = inlined_call_operand.hbm [shape: f32[8,32], index: 7, kind: output, shape index: {2}]  }
   0x1   :  { %v34_v0 = vld [vmem:[%s639_s2 + $0x38] sm:$0xff]  ;;  %386 = vmatprep.subr.mxu1 %v506_v1  ;;  %v33_v2 = vld [vmem:[%s639_s2 + $0x30] sm:$0xff]  ;;  %394 = vmatprep.mubr.msk.f32.mxu1 %vm507_vm0, %v506_v1  ;;  %v26_v3 = vld [vmem:[%s638_s1] sm:$0xff] }
   0x2   :  { %387 = vmatpush3.msra.mxu1 %v34_v0  ;;  %432 = vtanh.f32 %v26_v3  ;;  %408 = vmatprep.subr.mxu0 %v506_v1  ;;  %v32_v4 = vld [vmem:[%s639_s2 + $0x28] sm:$0xff]  ;;  %v25_v5 = vld [vmem:[%s637_s0] sm:$0xff] }
   0x3   :  { %388 = vmatprep.subr.mxu1 %v506_v1  ;;  %424 = vmatprep.mubr.msk.f32.mxu0 %vm507_vm0, %v506_v1 }
   0x4   :  { %14 = vsyncpa [#allocation5], 0  ;;  %389 = vmatpush3.msra.mxu1 %v33_v2  ;;  %434 = vtanh.f32 %v25_v5  ;;  %v31_v6 = vld [vmem:[%s639_s2 + $0x20] sm:$0xff]  ;;  %vm35_vm1 = vcmask 261120   ;;  %v30_v7 = vld [vmem:[%s639_s2 + $0x18] sm:$0xff]  ;;  %vm182_vm2 = vcmask 523264   ;;  %v212_v47 = vlaneseq }
   0x5   :  { %390 = vmatprep.subr.mxu1 %v506_v1  ;;  %v29_v8 = vld [vmem:[%s639_s2 + $0x10] sm:$0xff]  ;;  %v28_v9 = vld [vmem:[%s639_s2 + $0x8] sm:$0xff]  ;;  %v27_v10 = vld [vmem:[%s639_s2] sm:$0xff]  ;;  %s508_s1 = smov [#allocation4]  }
   0x6   :  { %391 = vmatpush3.msra.mxu1 %v32_v4  ;;  %v230_v13 = vld [vmem:[%s640_s3 + $0x38] sm:$0xff]  ;;  %v229_v14 = vld [vmem:[%s640_s3 + $0x30] sm:$0xff]  ;;  %v228_v15 = vld [vmem:[%s640_s3 + $0x28] sm:$0xff]  ;;  %v213_v48 = vshrl.u32 %v212_v47, 7  ;;  %s338_s12 = sshll.u32 %s508_s1, 4  ;;  %s339_s12 = int_to_ptr.vmem [resolvable:$true] %s338_s12 }
   0x7   :  { %392 = vmatprep.subr.mxu1 %v506_v1  ;;  %409 = vmatpush3.msra.mxu0 %v230_v13  ;;  %v227_v16 = vld [vmem:[%s640_s3 + $0x20] sm:$0xff]  ;;  %v226_v17 = vld [vmem:[%s640_s3 + $0x18] sm:$0xff]  ;;  %v225_v18 = vld [vmem:[%s640_s3 + $0x10] sm:$0xff]  ;;  %s442_s13 = scalar_lea.vmem %s339_s12, 128  ;;  %p447_p1 = scmp.lt.s32.totalorder %s339_s12, %s339_s12 }
   0x8   :  { %393 = vmatpush3.msra.mxu1 %v31_v6  ;;  %410 = vmatprep.subr.mxu0 %v506_v1  ;;  %v224_v19 = vld [vmem:[%s640_s3 + $0x8] sm:$0xff]  ;;  %v223_v20 = vld [vmem:[%s640_s3] sm:$0xff]  ;;  %v214_v52 = vsub.s32 0, %v213_v48  ;;  %v219_v56 = vsub.s32 1, %v213_v48  ;;  %p443_p0 = scmp.ne.s32.totalorder %s339_s12, %s442_s13  ;;  %p448_p2 = scmp.lt.s32.totalorder %s442_s13, %s442_s13 }
   0x9   :  { %395 = vmatmul.mubr.msk.f32.vlgmr.msra.gmra.mxu1 %vm35_vm1, %v26_v3  ;;  %397 = vmatprep.subr.mxu1 %v506_v1  ;;  %v203_v49 = vld [vmem:[%s641_s4] sm:$0x7] }
   0xa   :  { %398 = vmatpush3.msra.mxu1 %v30_v7  ;;  %405 = vmatprep.mubr.msk.f32.mxu1 %vm507_vm0, %v506_v1  ;;  %p449_p3 = por %p448_p2, %p447_p1 }
   0xb   :  { %399 = vmatprep.subr.mxu1 %v506_v1  ;;  %411 = vmatpush3.msra.mxu0 %v229_v14 }
   0xc   :  { %400 = vmatpush3.msra.mxu1 %v29_v8  ;;  %412 = vmatprep.subr.mxu0 %v506_v1  ;;  %p450_p4 = pnand %p449_p3, %p443_p0 }
   0xd   :  { %401 = vmatprep.subr.mxu1 %v506_v1  ;;  %413 = vmatpush3.msra.mxu0 %v228_v15 }
   0xe   :  { %402 = vmatpush3.msra.mxu1 %v28_v9  ;;  %414 = vmatprep.subr.mxu0 %v506_v1 }
   0xf   :  { %v585_v11 = vpop.eup %432  ;;  %403 = vmatprep.subr.mxu1 %v506_v1  ;;  %415 = vmatpush3.msra.mxu0 %v227_v16 }
  0x10   :  { %321 = vst.msk [vmem:[#allocation6] sm:$0xff] %vm35_vm1, %v585_v11  ;;  %404 = vmatpush3.msra.mxu1 %v27_v10  ;;  %416 = vmatprep.subr.mxu0 %v506_v1 }
  0x11   :  { %v589_v12 = vpop.eup %434  ;;  %406 = vmatmul.mubr.msk.f32.vlgmr.msra.gmra.mxu1 %vm35_vm1, %v25_v5  ;;  %417 = vmatpush3.msra.mxu0 %v226_v17 }
  0x12   :  { %320 = vst.msk [vmem:[#allocation4] sm:$0xff] %vm35_vm1, %v589_v12  ;;  %418 = vmatprep.subr.mxu0 %v506_v1 }
  0x13   :  { %419 = vmatpush3.msra.mxu0 %v225_v18 }
  0x14   :  { %420 = vmatprep.subr.mxu0 %v506_v1 }
  0x15   :  { %421 = vmatpush3.msra.mxu0 %v224_v19 }
  0x16   :  { %422 = vmatprep.subr.mxu0 %v506_v1 }
  0x17   :  { %423 = vmatpush3.msra.mxu0 %v223_v20 }
  0xc9   :  { %v105_v21 = vpop.f32.mrf.mxu1 }
  0xcb   :  { %v396_v22 = vpop.f32.mrf.mxu1 }
  0xd1   :  { %v178_v23 = vpop.f32.mrf.mxu1 }
  0xd2   :  { %v179_v24 = vadd.f32 %v178_v23, %v105_v21 }
  0xd3   :  { %v407_v25 = vpop.f32.mrf.mxu1 }
  0xd4   :  { %v190_v26 = vmul.f32 %v179_v24, %v179_v24  ;;  %v183_v27 = vsel %vm182_vm2, %v179_v24, 0.0 }
  0xd5   :  { %v184_v28 = vrot.slane %v183_v27, 4 }
  0xd6   :  { %v191_v29 = vsel %vm182_vm2, %v190_v26, 0.0 }
  0xd7   :  { %v185_v30 = vadd.f32 %v184_v28, %v183_v27  ;;  %v192_v31 = vrot.slane %v191_v29, 4 }
  0xd9   :  { %v186_v32 = vrot.slane %v185_v30, 2  ;;  %v193_v33 = vadd.f32 %v192_v31, %v191_v29 }
  0xdb   :  { %v187_v34 = vadd.f32 %v186_v32, %v185_v30  ;;  %v194_v35 = vrot.slane %v193_v33, 2 }
  0xdd   :  { %v188_v36 = vrot.slane %v187_v34, 1  ;;  %v195_v37 = vadd.f32 %v194_v35, %v193_v33 }
  0xdf   :  { %v189_v38 = vadd.f32 %v188_v36, %v187_v34  ;;  %v196_v39 = vrot.slane %v195_v37, 1 }
  0xe1   :  { %v197_v40 = vadd.f32 %v196_v39, %v195_v37  ;;  %v198_v41 = vmul.f32 0.125, %v189_v38 }
  0xe3   :  { %v199_v42 = vmul.f32 0.125, %v197_v40  ;;  %v200_v43 = vmul.f32 %v198_v41, %v198_v41 }
  0xe5   :  { %v201_v44 = vsub.f32 %v199_v42, %v200_v43 }
  0xe7   :  { %v202_v45 = vmax.f32 %v201_v44, 0.0 }
  0xe9   :  { %v204_v46 = vadd.f32 1e-05, %v202_v45 }
  0xeb   :  { %436 = vrsqrt.f32 %v204_v46 }
  0xf8   :  { %v437_v50 = vpop.eup %436 }
  0xf9   :  { %v206_v51 = vmul.f32 %v437_v50, %v203_v49 }
  0xfb   :  { %v207_v53 = vmul.f32 %v206_v51, %v198_v41  ;;  %v215_v55 = vrot.slane %v206_v51, %v214_v52 }
  0xfd   :  { %v209_v54 = vrot.slane %v207_v53, 7  ;;  %v216_v58 = vmul.f32 %v215_v55, %v179_v24 }
  0xff   :  { %v211_v57 = vsub.f32 %v203_v49, %v209_v54 }
 0x101   :  { %v220_v59 = vrot.slane %v211_v57, %v219_v56 }
 0x103   :  { %v221_v60 = vadd.f32 %v220_v59, %v216_v58 }
 0x105   :  { %v222_v61 = vmax.f32 %v221_v60, 0.0 }
 0x107   :  { %425 = vmatmul.mubr.msk.f32.vlgmr.msra.gmra.mxu0 %vm182_vm2, %v222_v61 }
 0x108   :  { %453 = shalt.err (!%p450_p4)
}
 0x109   :  { %341 = dma.vmem_to_hbm [thread:$0]  %s339_s12, 128, %s643_s6, [#allocation5]  }
 0x10a   :  { %s509_s14 = smov [#allocation6]  }
 0x10b   :  { %s348_s15 = sshll.u32 %s509_s14, 4  ;;  %s349_s15 = int_to_ptr.vmem [resolvable:$true] %s348_s15 }
 0x10c   :  { %s462_s16 = scalar_lea.vmem %s349_s15, 128  ;;  %p467_p6 = scmp.lt.s32.totalorder %s349_s15, %s349_s15 }
 0x10d   :  { %p463_p5 = scmp.ne.s32.totalorder %s349_s15, %s462_s16  ;;  %p468_p7 = scmp.lt.s32.totalorder %s462_s16, %s462_s16 }
 0x10f   :  { %p469_p8 = por %p468_p7, %p467_p6 }
 0x111   :  { %p470_p9 = pnand %p469_p8, %p463_p5 }
 0x113   :  { %473 = shalt.err (!%p470_p9)
}
 0x114   :  { %351 = dma.vmem_to_hbm [thread:$0]  %s349_s15, 128, %s644_s7, [#allocation5]   ;;  %v233_v62 = vsub.s32 2, %v213_v48  ;;  %v316_v6 = vsub.f32 %v589_v12, %v585_v11 }
 0x115   :  { %s510_s6 = smov [#allocation2]  }
 0x116   :  { %v234_v63 = vrot.slane %v203_v49, %v233_v62  ;;  %s328_s19 = sshll.u32 %s510_s6, 4  ;;  %s329_s19 = int_to_ptr.vmem [resolvable:$true] %s328_s19 }
 0x117   :  { %s482_s7 = scalar_lea.vmem %s329_s19, 128  ;;  %p487_p11 = scmp.lt.s32.totalorder %s329_s19, %s329_s19 }
 0x118   :  { %p483_p10 = scmp.ne.s32.totalorder %s329_s19, %s482_s7  ;;  %p488_p12 = scmp.lt.s32.totalorder %s482_s7, %s482_s7 }
 0x11a   :  { %p489_p13 = por %p488_p12, %p487_p11 }
 0x11c   :  { %p490_p0 = pnand %p489_p13, %p483_p10 }
 0x1c7   :  { %v304_v0 = vpop.f32.mrf.mxu0 }
 0x1c8   :  { %v305_v1 = vadd.f32 %v304_v0, %v234_v63 }
 0x1c9   :  { %v426_v2 = vpop.f32.mrf.mxu0 }
 0x1ca   :  { %v366_v3 = vmul.f32 -1.442695, %v305_v1 }
 0x1cc   :  { %438 = vpow2.f32 %v366_v3 }
 0x1d9   :  { %v439_v4 = vpop.eup %438 }
 0x1da   :  { %v311_v5 = vadd.f32 1.0, %v439_v4 }
 0x1dc   :  { %440 = vrcp.f32 %v311_v5 }
 0x1e9   :  { %v441_v7 = vpop.eup %440 }
 0x1ea   :  { %v317_v8 = vmul.f32 %v441_v7, %v316_v6 }
 0x1ec   :  { %v318_v9 = vadd.f32 %v585_v11, %v317_v8 }
 0x1ee   :  { %319 = vst.msk [vmem:[#allocation2] sm:$0xff] %vm35_vm1, %v318_v9 }
 0x1ef   :  { %493 = shalt.err (!%p490_p0)
}
 0x1f0   :  { %331 = dma.vmem_to_hbm [thread:$0]  %s329_s19, 128, %s642_s5, [#allocation3]  }
 0x1f1   :  { %502 = dma.done.wait [#allocation3], 128  }
 0x1f2   :  { %503 = vsyncadd [#allocation3], 4294967168 }
 0x1f3   :  { %504 = dma.done.wait [#allocation5], 256  }
 0x1f4   :  { %505 = vsyncadd [#allocation5], 4294967040 }
 0x1f5   :  { %361 = vsyncpa [#allocation3], 1 }
 0x1f6   :  { %362 = vsyncpa [#allocation5], 1 }

</bundles_post_ra>
